<compile_context>
chip_gen: v7x
topology: tpu7x:2x2x1
jax: 0.10.0
libtpu: 0.0.40
codegen_flags: <defaults>
</compile_context>

<pallas_src>
import math

import jax
import jax.numpy as jnp
from jax.experimental import pallas as pl
from jax.experimental.pallas import tpu as pltpu


_SQRT_2_OVER_PI = 0.7978845608028654  # sqrt(2 / pi)

_VMEM_BUDGET = 40 << 20        # conservative tile budget (fits v7x 64 MiB physical)
_VMEM_LIMIT_BYTES = 48 << 20   # explicit scoped-VMEM limit passed to Mosaic


def _gelu_tanh(h):
    # torch.nn.GELU(approximate='tanh'), computed in f32.
    return 0.5 * h * (1.0 + jnp.tanh(_SQRT_2_OVER_PI * (h + 0.044715 * h * h * h)))


def _mlp_kernel_resident(x_ref, wfc_ref, bfc_ref, wproj_ref, bproj_ref, o_ref):
    """Weights-resident path: single h-step, no accumulator scratch."""
    h = jnp.dot(x_ref[...], wfc_ref[...], preferred_element_type=jnp.float32)
    h = h + bfc_ref[...]                              # (1, H) broadcast, f32
    g = _gelu_tanh(h)
    out = jnp.dot(g.astype(wproj_ref.dtype), wproj_ref[...],
                  preferred_element_type=jnp.float32) + bproj_ref[...]
    o_ref[...] = out.astype(o_ref.dtype)


def _mlp_kernel_streamed(x_ref, wfc_ref, bfc_ref, wproj_ref, bproj_ref, o_ref,
                         acc_ref):
    """Streamed path: H tiled over the inner ('arbitrary') grid axis."""
    h_idx = pl.program_id(1)

    @pl.when(h_idx == 0)
    def _():
        # Fold b_proj into the accumulator init (no separate finalize add).
        acc_ref[...] = jnp.broadcast_to(bproj_ref[...], acc_ref.shape
                                        ).astype(jnp.float32)

    # c_fc slab: (tm, C) @ (C, th) -> (tm, th), bf16 in / f32 accumulate (MXU).
    h = jnp.dot(x_ref[...], wfc_ref[...], preferred_element_type=jnp.float32)
    h = h + bfc_ref[...]                              # (1, th) broadcast, f32
    g = _gelu_tanh(h)

    # c_proj slab: (tm, th) @ (th, C) -> accumulate into (tm, C) f32.
    acc_ref[...] += jnp.dot(g.astype(wproj_ref.dtype), wproj_ref[...],
                            preferred_element_type=jnp.float32)

    @pl.when(h_idx == pl.num_programs(1) - 1)
    def _():
        o_ref[...] = acc_ref[...].astype(o_ref.dtype)


def _round_up(n, m):
    return (n + m - 1) // m * m


def _round_down(n, m):
    return n // m * m


def _pick_th(H, th):
    """Largest hidden-dim tile <= th that is a multiple of 128 and divides H."""
    th = min(th, H)
    if th >= H:
        return H
    if th % 128 == 0 and H % th == 0:
        return th
    for cand in range(_round_down(th, 128), 0, -128):
        if H % cand == 0:
            return cand
    return H


def _resident_bytes(tm, C, H, out_bytes):
    x_b = 2 * tm * C * 2                 # x tile, bf16, double-buffered
    o_b = 2 * tm * C * out_bytes         # out tile, double-buffered
    w_b = 2 * (C * H + H * C) * 2        # both weights, bf16, double-buffered
    mid = 2 * tm * H * 4                 # (tm, H) f32 intermediates (h, g)
    return x_b + o_b + w_b + mid


def _streamed_bytes(tm, th, C, H, out_bytes):
    x_b = 2 * tm * C * 2
    o_b = 2 * tm * C * out_bytes
    w_b = 2 * (C * th + th * C) * 2      # weight slabs, bf16, double-buffered
    acc = tm * C * 4                     # f32 accumulator scratch
    mid = 2 * tm * th * 4                # (tm, th) f32 intermediates
    return x_b + o_b + w_b + acc + mid


def _choose_tiles(M, C, H, tm_req, th_req, out_bytes, allow_resident=True):
    M16 = _round_up(M, 16)
    tm = max(16, min(_round_down(max(tm_req, 16), 16), M16))
    # Keep >= 2 row tiles when there is enough work (v7x has 2 TensorCores).
    if M16 >= 512 and M16 // tm < 2:
        tm = max(256, _round_down(M16 // 2, 16))
    # Shrink tm until even the smallest streamed config fits the VMEM budget.
    while tm > 16 and _streamed_bytes(tm, min(128, H), C, H, out_bytes) > _VMEM_BUDGET:
        tm = max(16, _round_down(tm // 2, 16))

    # Weights-resident fast path: whole weight set stays in VMEM for the call.
    if allow_resident and _resident_bytes(tm, C, H, out_bytes) <= _VMEM_BUDGET:
        return tm, H, True

    # Streamed path: largest th (multiple of 128 dividing H) that fits.
    th = _pick_th(H, th_req)
    while th > 128 and _streamed_bytes(tm, th, C, H, out_bytes) > _VMEM_BUDGET:
        th = _pick_th(H, th - 128)
    return tm, th, False


def prepare_mlp_params(w_fc, b_fc, w_proj, b_proj):
    """One-time (outside the hot path) transpose + bf16 cast of the weights.

    PyTorch nn.Linear convention: w_fc (4C, C), w_proj (C, 4C).
    Returns row-major operands: W_fc^T (C, 4C) bf16, b_fc (1, 4C) f32,
                                W_proj^T (4C, C) bf16, b_proj (1, C) f32.
    """
    H, C = w_fc.shape
    wfc_t = jnp.asarray(w_fc.T, dtype=jnp.bfloat16)        # (C, H)
    wproj_t = jnp.asarray(w_proj.T, dtype=jnp.bfloat16)    # (H, C)
    bfc_2d = jnp.asarray(b_fc, dtype=jnp.float32).reshape(1, H)
    bproj_2d = jnp.asarray(b_proj, dtype=jnp.float32).reshape(1, C)
    return wfc_t, bfc_2d, wproj_t, bproj_2d


def mlp_forward(x, wfc_t, bfc_2d, wproj_t, bproj_2d, *, tm=512, th=1024,
                out_dtype=None, force_streamed=False):
    """x: (B, T, C). Other args from prepare_mlp_params().

    out_dtype defaults to x.dtype; pass jnp.bfloat16 if the consumer accepts it
    (halves output writeback bytes)."""
    B, T, C = x.shape
    H = wfc_t.shape[1]                                   # 4C
    M = B * T
    out_dtype = jnp.dtype(out_dtype) if out_dtype is not None else x.dtype

    tm, th, resident = _choose_tiles(M, C, H, tm, th, out_dtype.itemsize,
                                     allow_resident=not force_streamed)
    M_pad = _round_up(M, tm)

    x2d = x.reshape(M, C).astype(jnp.bfloat16)
    if M_pad != M:
        # Padded rows produce garbage (gelu(b_fc) @ Wp + b_proj); sliced off below.
        x2d = jnp.pad(x2d, ((0, M_pad - M), (0, 0)))

    if resident:
        grid_spec = pltpu.PrefetchScalarGridSpec(
            num_scalar_prefetch=0,
            grid=(M_pad // tm,),
            in_specs=[
                pl.BlockSpec((tm, C), lambda i: (i, 0)),   # x row tile
                pl.BlockSpec((C, H), lambda i: (0, 0)),    # W_fc^T (constant idx)
                pl.BlockSpec((1, H), lambda i: (0, 0)),    # b_fc
                pl.BlockSpec((H, C), lambda i: (0, 0)),    # W_proj^T (constant idx)
                pl.BlockSpec((1, C), lambda i: (0, 0)),    # b_proj
            ],
            out_specs=pl.BlockSpec((tm, C), lambda i: (i, 0)),
        )
        kernel = _mlp_kernel_resident
        dim_sem = ("parallel",)
    else:
        grid_spec = pltpu.PrefetchScalarGridSpec(
            num_scalar_prefetch=0,
            grid=(M_pad // tm, H // th),                   # reduction (H) axis last
            in_specs=[
                pl.BlockSpec((tm, C), lambda i, h: (i, 0)),   # x row tile
                pl.BlockSpec((C, th), lambda i, h: (0, h)),   # W_fc^T slab
                pl.BlockSpec((1, th), lambda i, h: (0, h)),   # b_fc slab
                pl.BlockSpec((th, C), lambda i, h: (h, 0)),   # W_proj^T slab
                pl.BlockSpec((1, C), lambda i, h: (0, 0)),    # b_proj
            ],
            out_specs=pl.BlockSpec((tm, C), lambda i, h: (i, 0)),
            scratch_shapes=[pltpu.VMEM((tm, C), jnp.float32)],  # f32 accumulator
        )
        kernel = _mlp_kernel_streamed
        dim_sem = ("parallel", "arbitrary")

    out2d = pl.pallas_call(
        kernel,
        out_shape=jax.ShapeDtypeStruct((M_pad, C), out_dtype),
        grid_spec=grid_spec,
        compiler_params=pltpu.CompilerParams(
            dimension_semantics=dim_sem,
            vmem_limit_bytes=_VMEM_LIMIT_BYTES),
    )(x2d, wfc_t, bfc_2d, wproj_t, bproj_2d)

    return out2d[:M].reshape(B, T, C)


def _reference_mlp(x, w_fc, b_fc, w_proj, b_proj):
    h = jnp.einsum("btc,hc->bth", x, w_fc) + b_fc
    c = math.sqrt(2.0 / math.pi)
    g = 0.5 * h * (1.0 + jnp.tanh(c * (h + 0.044715 * h ** 3)))
    return jnp.einsum("bth,ch->btc", g, w_proj) + b_proj


if __name__ == "__main__":
    # Small config: batch=2, seq=8, n_embed=128 -> hidden = 4*128 = 512
    # (lane-dense C; real GPT configs C=768/1024/... are also multiples of 128)
    B, T, C = 2, 8, 128
    H = 4 * C

    key = jax.random.PRNGKey(0)
    kx, k1, k2, k3, k4 = jax.random.split(key, 5)

    x = jax.random.normal(kx, (B, T, C), dtype=jnp.float32)
    # nn.Linear default-ish init (uniform, deterministic here)
    w_fc = jax.random.uniform(k1, (H, C), minval=-1.0 / math.sqrt(C),
                              maxval=1.0 / math.sqrt(C), dtype=jnp.float32)
    b_fc = jax.random.uniform(k2, (H,), minval=-1.0 / math.sqrt(C),
                              maxval=1.0 / math.sqrt(C), dtype=jnp.float32)
    w_proj = jax.random.uniform(k3, (C, H), minval=-1.0 / math.sqrt(H),
                                maxval=1.0 / math.sqrt(H), dtype=jnp.float32)
    b_proj = jax.random.uniform(k4, (C,), minval=-1.0 / math.sqrt(H),
                                maxval=1.0 / math.sqrt(H), dtype=jnp.float32)

    # One-time parameter prep (transpose + bf16) outside the hot path.
    params = prepare_mlp_params(w_fc, b_fc, w_proj, b_proj)
    ref = _reference_mlp(x, w_fc, b_fc, w_proj, b_proj)

    # Fast path (weights resident, single h-step).
    out_res = jax.block_until_ready(mlp_forward(x, *params))
    assert out_res.shape == (B, T, C)
    assert jnp.allclose(out_res, ref, atol=5e-2, rtol=5e-2), \
        "resident-path mismatch vs reference"

    # Streamed path (exercises the H-axis accumulator pipeline).
    out_str = jax.block_until_ready(
        mlp_forward(x, *params, th=128, force_streamed=True))
    assert out_str.shape == (B, T, C)
    assert jnp.allclose(out_str, ref, atol=5e-2, rtol=5e-2), \
        "streamed-path mismatch vs reference"

    print("KERNEL_OK")
</pallas_src>

<mosaic_0001>
module attributes {stable_mosaic.version = 11 : i64} {
  func.func @_mlp_kernel_resident(%arg0: i32, %arg1: memref<16x128xbf16, #tpu.memory_space<vmem>>, %arg2: memref<128x512xbf16, #tpu.memory_space<vmem>>, %arg3: memref<1x512xf32, #tpu.memory_space<vmem>>, %arg4: memref<512x128xbf16, #tpu.memory_space<vmem>>, %arg5: memref<1x128xf32, #tpu.memory_space<vmem>>, %arg6: memref<16x128xf32, #tpu.memory_space<vmem>>) attributes {dimension_semantics = [#tpu.dimension_semantics<parallel>], iteration_bounds = array<i64: 1>, scalar_prefetch = 0 : i64, scratch_operands = 0 : i64, tpu.core_type = #tpu.core_type<tc>, window_params = [{transform_indices = @transform_0, window_bounds = array<i64: 16, 128>}, {pipeline_mode = #tpu.pipeline_mode<synchronous>, transform_indices = @transform_1, window_bounds = array<i64: 128, 512>}, {pipeline_mode = #tpu.pipeline_mode<synchronous>, transform_indices = @transform_2, window_bounds = array<i64: 1, 512>}, {pipeline_mode = #tpu.pipeline_mode<synchronous>, transform_indices = @transform_3, window_bounds = array<i64: 512, 128>}, {pipeline_mode = #tpu.pipeline_mode<synchronous>, transform_indices = @transform_4, window_bounds = array<i64: 1, 128>}, {transform_indices = @transform_5, window_bounds = array<i64: 16, 128>}]} {
    %c0 = arith.constant 0 : index
    %c0_0 = arith.constant 0 : index
    %0 = vector.load %arg1[%c0, %c0_0] : memref<16x128xbf16, #tpu.memory_space<vmem>>, vector<16x128xbf16>
    %c0_1 = arith.constant 0 : index
    %c0_2 = arith.constant 0 : index
    %1 = vector.load %arg2[%c0_1, %c0_2] : memref<128x512xbf16, #tpu.memory_space<vmem>>, vector<128x512xbf16>
    %cst = arith.constant dense<0.000000e+00> : vector<16x512xf32>
    %2 = tpu.matmul %0, %1, %cst {dimension_numbers = #tpu.dot_dimension_numbers<[1], [0], [0], [1], [0, 0, 1, 1], [], []>} : vector<16x128xbf16>, vector<128x512xbf16>, vector<16x512xf32> -> vector<16x512xf32>
    %c0_3 = arith.constant 0 : index
    %c0_4 = arith.constant 0 : index
    %3 = vector.load %arg3[%c0_3, %c0_4] : memref<1x512xf32, #tpu.memory_space<vmem>>, vector<1x512xf32>
    %4 = vector.broadcast %3 : vector<1x512xf32> to vector<16x512xf32>
    %5 = arith.addf %2, %4 : vector<16x512xf32>
    %cst_5 = arith.constant 5.000000e-01 : f32
    %6 = vector.broadcast %cst_5 : f32 to vector<16x512xf32>
    %7 = arith.mulf %6, %5 : vector<16x512xf32>
    %cst_6 = arith.constant 4.471500e-02 : f32
    %8 = vector.broadcast %cst_6 : f32 to vector<16x512xf32>
    %9 = arith.mulf %8, %5 : vector<16x512xf32>
    %10 = arith.mulf %9, %5 : vector<16x512xf32>
    %11 = arith.mulf %10, %5 : vector<16x512xf32>
    %12 = arith.addf %5, %11 : vector<16x512xf32>
    %cst_7 = arith.constant 0.797884583 : f32
    %13 = vector.broadcast %cst_7 : f32 to vector<16x512xf32>
    %14 = arith.mulf %13, %12 : vector<16x512xf32>
    %15 = math.tanh %14 : vector<16x512xf32>
    %cst_8 = arith.constant 1.000000e+00 : f32
    %16 = vector.broadcast %cst_8 : f32 to vector<16x512xf32>
    %17 = arith.addf %16, %15 : vector<16x512xf32>
    %18 = arith.mulf %7, %17 : vector<16x512xf32>
    %19 = arith.truncf %18 : vector<16x512xf32> to vector<16x512xbf16>
    %c0_9 = arith.constant 0 : index
    %c0_10 = arith.constant 0 : index
    %20 = vector.load %arg4[%c0_9, %c0_10] : memref<512x128xbf16, #tpu.memory_space<vmem>>, vector<512x128xbf16>
    %cst_11 = arith.constant dense<0.000000e+00> : vector<16x128xf32>
    %21 = tpu.matmul %19, %20, %cst_11 {dimension_numbers = #tpu.dot_dimension_numbers<[1], [0], [0], [1], [0, 0, 1, 1], [], []>} : vector<16x512xbf16>, vector<512x128xbf16>, vector<16x128xf32> -> vector<16x128xf32>
    %c0_12 = arith.constant 0 : index
    %c0_13 = arith.constant 0 : index
    %22 = vector.load %arg5[%c0_12, %c0_13] : memref<1x128xf32, #tpu.memory_space<vmem>>, vector<1x128xf32>
    %23 = vector.broadcast %22 : vector<1x128xf32> to vector<16x128xf32>
    %24 = arith.addf %21, %23 : vector<16x128xf32>
    %c0_14 = arith.constant 0 : index
    %c0_15 = arith.constant 0 : index
    %25 = vector.load %arg6[%c0_14, %c0_15] : memref<16x128xf32, #tpu.memory_space<vmem>>, vector<16x128xf32>
    tpu.vector_store %arg6[%c0_14, %c0_15], %24 {strides = array<i32>} : memref<16x128xf32, #tpu.memory_space<vmem>>, vector<16x128xf32>,
    return
  }
  func.func @transform_0(%arg0: i32) -> (i32, i32) {
    %c0_i32 = arith.constant 0 : i32
    %c0_i32_0 = arith.constant 0 : i32
    return %arg0, %c0_i32 : i32, i32
  }
  func.func @transform_1(%arg0: i32) -> (i32, i32) {
    %c0_i32 = arith.constant 0 : i32
    %c0_i32_0 = arith.constant 0 : i32
    %c0_i32_1 = arith.constant 0 : i32
    return %c0_i32, %c0_i32_0 : i32, i32
  }
  func.func @transform_2(%arg0: i32) -> (i32, i32) {
    %c0_i32 = arith.constant 0 : i32
    %c0_i32_0 = arith.constant 0 : i32
    %c0_i32_1 = arith.constant 0 : i32
    return %c0_i32, %c0_i32_0 : i32, i32
  }
  func.func @transform_3(%arg0: i32) -> (i32, i32) {
    %c0_i32 = arith.constant 0 : i32
    %c0_i32_0 = arith.constant 0 : i32
    %c0_i32_1 = arith.constant 0 : i32
    return %c0_i32, %c0_i32_0 : i32, i32
  }
  func.func @transform_4(%arg0: i32) -> (i32, i32) {
    %c0_i32 = arith.constant 0 : i32
    %c0_i32_0 = arith.constant 0 : i32
    %c0_i32_1 = arith.constant 0 : i32
    return %c0_i32, %c0_i32_0 : i32, i32
  }
  func.func @transform_5(%arg0: i32) -> (i32, i32) {
    %c0_i32 = arith.constant 0 : i32
    %c0_i32_0 = arith.constant 0 : i32
    return %arg0, %c0_i32 : i32, i32
  }
}

</mosaic_0001>

<bundles_post_ra>
// kernel: tpu_custom_call.1
= control target key start
LH: loop header
LB: loop body
LE: loop exit
PB: predicated region body
PF: predicated region fallthrough
CT: control target
= control target key end

     0   :  { %10 = vsyncpa [#allocation3], 0  ;;  %s1261_s0 = inlined_call_operand.hbm [shape: bf16[16,128], index: 0, kind: input, shape index: {}]   ;;  %s1262_s1 = inlined_call_operand.hbm [shape: bf16[128,512], index: 1, kind: input, shape index: {}]   ;;  %s1263_s2 = inlined_call_operand.vmem [shape: f32[1,512], index: 2, kind: input, shape index: {}]   ;;  %s1264_s3 = inlined_call_operand.hbm [shape: bf16[512,128], index: 3, kind: input, shape index: {}]   ;;  %s1265_s4 = inlined_call_operand.vmem [shape: f32[1,128], index: 4, kind: input, shape index: {}]   ;;  %s1266_s5 = inlined_call_operand.hbm [shape: f32[16,128], index: 5, kind: output, shape index: {}]  }
   0x1   :  { %11 = vsyncpa [#allocation6], 0 }
   0x2   :  { %12 = vsyncpa [#allocation4], 0  ;;  %s1124_s18 = smov [#allocation5]   ;;  %s1030_s22 = scalar_lea.hbm %s1262_s1, 4096 }
   0x3   :  { %s30_s19 = sshll.u32 %s1124_s18, 4  ;;  %p1031_p0 = scmp.ne.s32.totalorder %s1262_s1, %s1030_s22  ;;  %s31_s19 = int_to_ptr.vmem [resolvable:$true] %s30_s19 }
   0x4   :  { %p1034_p1 = scmp.lt.u32.totalorder %s1030_s22, %s1262_s1 }
   0x6   :  { %p1036_p2 = pnand %p1034_p1, %p1031_p0 }
   0x8   :  { %1039 = shalt.err (!%p1036_p2)
}
   0x9   :  { %s1040_s27 = scalar_lea.vmem %s31_s19, 4096  ;;  %p1045_p4 = scmp.lt.s32.totalorder %s31_s19, %s31_s19 }
   0xa   :  { %p1041_p3 = scmp.ne.s32.totalorder %s31_s19, %s1040_s27  ;;  %p1046_p5 = scmp.lt.s32.totalorder %s1040_s27, %s1040_s27 }
   0xc   :  { %p1047_p6 = por %p1046_p5, %p1045_p4 }
   0xe   :  { %p1048_p7 = pnand %p1047_p6, %p1041_p3 }
  0x10   :  { %1051 = shalt.err (!%p1048_p7)
}
  0x11   :  { %s1125_s28 = smov 256   ;;  %s1126_s29 = smov 16  }
  0x12   :  { %36 = dma.hbm_to_vmem [thread:$0]  %s1262_s1, 4096, %s31_s19, [#allocation6], %s1125_s28, %s1125_s28, %s1126_s29  }
  0x13   :  { %s1127_s7 = smov [#allocation2]   ;;  %s1052_s11 = scalar_lea.hbm %s1261_s0, 128 }
  0x14   :  { %s18_s8 = sshll.u32 %s1127_s7, 4  ;;  %p1053_p8 = scmp.ne.s32.totalorder %s1261_s0, %s1052_s11  ;;  %s19_s8 = int_to_ptr.vmem [resolvable:$true] %s18_s8 }
  0x15   :  { %p1056_p9 = scmp.lt.u32.totalorder %s1052_s11, %s1261_s0 }
  0x17   :  { %p1058_p10 = pnand %p1056_p9, %p1053_p8 }
  0x19   :  { %1061 = shalt.err (!%p1058_p10)
}
  0x1a   :  { %s1062_s16 = scalar_lea.vmem %s19_s8, 128  ;;  %p1067_p12 = scmp.lt.s32.totalorder %s19_s8, %s19_s8 }
  0x1b   :  { %p1063_p11 = scmp.ne.s32.totalorder %s19_s8, %s1062_s16  ;;  %p1068_p13 = scmp.lt.s32.totalorder %s1062_s16, %s1062_s16 }
  0x1d   :  { %p1069_p0 = por %p1068_p13, %p1067_p12 }
  0x1f   :  { %p1070_p1 = pnand %p1069_p0, %p1063_p11 }
  0x21   :  { %1073 = shalt.err (!%p1070_p1)
}
  0x22   :  { %s1128_s1 = smov 64   ;;  %s1129_s17 = smov 4  }
  0x23   :  { %24 = dma.hbm_to_vmem [thread:$0]  %s1261_s0, 128, %s19_s8, [#allocation3], %s1128_s1, %s1128_s1, %s1129_s17  }
  0x24   :  { %s1130_s20 = smov [#allocation7]   ;;  %s1074_s24 = scalar_lea.hbm %s1264_s3, 4096 }
  0x25   :  { %s44_s21 = sshll.u32 %s1130_s20, 4  ;;  %p1075_p2 = scmp.ne.s32.totalorder %s1264_s3, %s1074_s24  ;;  %s45_s21 = int_to_ptr.vmem [resolvable:$true] %s44_s21 }
  0x26   :  { %p1078_p3 = scmp.lt.u32.totalorder %s1074_s24, %s1264_s3 }
  0x28   :  { %p1080_p4 = pnand %p1078_p3, %p1075_p2 }
  0x2a   :  { %1083 = shalt.err (!%p1080_p4)
}
  0x2b   :  { %s1084_s29 = scalar_lea.vmem %s45_s21, 4096  ;;  %p1089_p6 = scmp.lt.s32.totalorder %s45_s21, %s45_s21 }
  0x2c   :  { %p1085_p5 = scmp.ne.s32.totalorder %s45_s21, %s1084_s29  ;;  %p1090_p7 = scmp.lt.s32.totalorder %s1084_s29, %s1084_s29 }
  0x2e   :  { %p1091_p8 = por %p1090_p7, %p1089_p6 }
  0x30   :  { %p1092_p9 = pnand %p1091_p8, %p1085_p5 }
  0x32   :  { %1095 = shalt.err (!%p1092_p9)
}
  0x33   :  { %50 = dma.hbm_to_vmem [thread:$0]  %s1264_s3, 4096, %s45_s21, [#allocation6], %s1128_s1, %s1128_s1, %s1129_s17  }
  0x34   :  { %1118 = dma.done.wait [#allocation3], 128  }
  0x35   :  { %1119 = vsyncadd [#allocation3], 4294967168 }
  0x36   :  { %1120 = dma.done.wait [#allocation6], 8192  }
  0x37   :  { %1121 = vsyncadd [#allocation6], 4294959104  ;;  %v1131_v0 = vmov 0   ;;  %v933_v1 = vld [vmem:[#allocation5 + $0x4] ss:$16 sps:$4 sm:$0xff]   ;;  %v981_v33 = vld [vmem:[#allocation2] sm:$0xff]  }
  0x38   :  { %317 = vmatprep.mubr.bf16.mxu0 %v1131_v0  ;;  %360 = vmatprep.mubr.bf16.mxu1 %v1131_v0  ;;  %v935_v2 = vld [vmem:[#allocation5 + $0xc] ss:$16 sps:$4 sm:$0xff]   ;;  %v937_v3 = vld [vmem:[#allocation5] ss:$16 sps:$4 sm:$0xff]   ;;  %v938_v4 = vld [vmem:[#allocation5 + $0x8] ss:$16 sps:$4 sm:$0xff]  }
  0x39   :  { %285 = vmatprep.subr.bf16.mxu0 %v933_v1  ;;  %328 = vmatprep.subr.bf16.mxu1 %v935_v2  ;;  %v939_v5 = vld [vmem:[#allocation5 + $0x24] ss:$16 sps:$4 sm:$0xff]   ;;  %v941_v6 = vld [vmem:[#allocation5 + $0x2c] ss:$16 sps:$4 sm:$0xff]   ;;  %v943_v7 = vld [vmem:[#allocation5 + $0x20] ss:$16 sps:$4 sm:$0xff]   ;;  %v99_v2 = vlaneseq }
  0x3a   :  { %286 = vmatpush1.bf16.msra.mxu0 %v937_v3  ;;  %329 = vmatpush1.bf16.msra.mxu1 %v938_v4  ;;  %v944_v8 = vld [vmem:[#allocation5 + $0x28] ss:$16 sps:$4 sm:$0xff]   ;;  %v945_v9 = vld [vmem:[#allocation5 + $0x44] ss:$16 sps:$4 sm:$0xff]   ;;  %v947_v10 = vld [vmem:[#allocation5 + $0x4c] ss:$16 sps:$4 sm:$0xff]  }
  0x3b   :  { %287 = vmatprep.subr.bf16.mxu0 %v939_v5  ;;  %330 = vmatprep.subr.bf16.mxu1 %v941_v6  ;;  %v949_v11 = vld [vmem:[#allocation5 + $0x40] ss:$16 sps:$4 sm:$0xff]   ;;  %v950_v12 = vld [vmem:[#allocation5 + $0x48] ss:$16 sps:$4 sm:$0xff]   ;;  %v951_v13 = vld [vmem:[#allocation5 + $0x64] ss:$16 sps:$4 sm:$0xff]  }
  0x3c   :  { %v953_v14 = vld [vmem:[#allocation5 + $0x6c] ss:$16 sps:$4 sm:$0xff]   ;;  %v955_v15 = vld [vmem:[#allocation5 + $0x60] ss:$16 sps:$4 sm:$0xff]   ;;  %v956_v16 = vld [vmem:[#allocation5 + $0x68] ss:$16 sps:$4 sm:$0xff]  }
  0x3d   :  { %v957_v17 = vld [vmem:[#allocation5 + $0x84] ss:$16 sps:$4 sm:$0xff]   ;;  %v959_v18 = vld [vmem:[#allocation5 + $0x8c] ss:$16 sps:$4 sm:$0xff]   ;;  %v961_v19 = vld [vmem:[#allocation5 + $0x80] ss:$16 sps:$4 sm:$0xff]  }
  0x3e   :  { %288 = vmatpush1.bf16.msra.mxu0 %v943_v7  ;;  %331 = vmatpush1.bf16.msra.mxu1 %v944_v8  ;;  %v962_v20 = vld [vmem:[#allocation5 + $0x88] ss:$16 sps:$4 sm:$0xff]   ;;  %v963_v21 = vld [vmem:[#allocation5 + $0xa4] ss:$16 sps:$4 sm:$0xff]   ;;  %v965_v22 = vld [vmem:[#allocation5 + $0xac] ss:$16 sps:$4 sm:$0xff]  }
  0x3f   :  { %289 = vmatprep.subr.bf16.mxu0 %v945_v9  ;;  %332 = vmatprep.subr.bf16.mxu1 %v947_v10  ;;  %v967_v23 = vld [vmem:[#allocation5 + $0xa0] ss:$16 sps:$4 sm:$0xff]   ;;  %v968_v24 = vld [vmem:[#allocation5 + $0xa8] ss:$16 sps:$4 sm:$0xff]   ;;  %v969_v25 = vld [vmem:[#allocation5 + $0xc4] ss:$16 sps:$4 sm:$0xff]  }
  0x40   :  { %v971_v26 = vld [vmem:[#allocation5 + $0xcc] ss:$16 sps:$4 sm:$0xff]   ;;  %v973_v27 = vld [vmem:[#allocation5 + $0xc0] ss:$16 sps:$4 sm:$0xff]   ;;  %v974_v28 = vld [vmem:[#allocation5 + $0xc8] ss:$16 sps:$4 sm:$0xff]  }
  0x41   :  { %v975_v29 = vld [vmem:[#allocation5 + $0xe4] ss:$16 sps:$4 sm:$0xff]   ;;  %v977_v30 = vld [vmem:[#allocation5 + $0xec] ss:$16 sps:$4 sm:$0xff]   ;;  %v979_v31 = vld [vmem:[#allocation5 + $0xe0] ss:$16 sps:$4 sm:$0xff]  }
  0x42   :  { %290 = vmatpush1.bf16.msra.mxu0 %v949_v11  ;;  %333 = vmatpush1.bf16.msra.mxu1 %v950_v12  ;;  %v980_v32 = vld [vmem:[#allocation5 + $0xe8] ss:$16 sps:$4 sm:$0xff]   ;;  %v982_v34 = vld [vmem:[#allocation7 + $0x40] sm:$0xff]   ;;  %v990_v42 = vld [vmem:[#allocation7 + $0x50] sm:$0xff]   ;;  %v100_v3 = vshrl.u32 %v99_v2, 7  ;;  %s1132_s8 = smov [#allocation8]  }
  0x43   :  { %291 = vmatprep.subr.bf16.mxu0 %v951_v13  ;;  %334 = vmatprep.subr.bf16.mxu1 %v953_v14  ;;  %v983_v35 = vld [vmem:[#allocation7 + $0xc0] sm:$0xff]   ;;  %v986_v38 = vld [vmem:[#allocation7 + $0x48] sm:$0xff]   ;;  %v991_v43 = vld [vmem:[#allocation7 + $0xd0] sm:$0xff]   ;;  %s799_s9 = sshll.u32 %s1132_s8, 4  ;;  %s800_s9 = int_to_ptr.vmem [resolvable:$true] %s799_s9 }
  0x44   :  { %v984_v36 = vld [vmem:[#allocation7] sm:$0xff]   ;;  %v987_v39 = vld [vmem:[#allocation7 + $0xc8] sm:$0xff]   ;;  %v992_v44 = vld [vmem:[#allocation7 + $0x10] sm:$0xff]   ;;  %v101_v4 = vsub.s32 0, %v100_v3  ;;  %v109_v5 = vsub.s32 2, %v100_v3  ;;  %v105_v7 = vsub.s32 1, %v100_v3  ;;  %p1101_p11 = scmp.lt.s32.totalorder %s800_s9, %s800_s9 }
  0x45   :  { %v985_v37 = vld [vmem:[#allocation7 + $0x80] sm:$0xff]   ;;  %v988_v40 = vld [vmem:[#allocation7 + $0x8] sm:$0xff]   ;;  %v993_v45 = vld [vmem:[#allocation7 + $0x90] sm:$0xff]   ;;  %v113_v8 = vsub.s32 3, %v100_v3 }
  0x46   :  { %292 = vmatpush1.bf16.msra.mxu0 %v955_v15  ;;  %335 = vmatpush1.bf16.msra.mxu1 %v956_v16  ;;  %v989_v41 = vld [vmem:[#allocation7 + $0x88] sm:$0xff]   ;;  %v994_v46 = vld [vmem:[#allocation7 + $0x58] sm:$0xff]   ;;  %v998_v50 = vld [vmem:[#allocation7 + $0x60] sm:$0xff]  }
  0x47   :  { %293 = vmatprep.subr.bf16.mxu0 %v957_v17  ;;  %336 = vmatprep.subr.bf16.mxu1 %v959_v18  ;;  %v995_v47 = vld [vmem:[#allocation7 + $0xd8] sm:$0xff]   ;;  %v999_v51 = vld [vmem:[#allocation7 + $0xe0] sm:$0xff]   ;;  %v1002_v54 = vld [vmem:[#allocation7 + $0x68] sm:$0xff]  }
  0x48   :  { %v996_v48 = vld [vmem:[#allocation7 + $0x18] sm:$0xff]   ;;  %v1000_v52 = vld [vmem:[#allocation7 + $0x20] sm:$0xff]   ;;  %v1003_v55 = vld [vmem:[#allocation7 + $0xe8] sm:$0xff]  }
  0x49   :  { %v997_v49 = vld [vmem:[#allocation7 + $0x98] sm:$0xff]   ;;  %v1001_v53 = vld [vmem:[#allocation7 + $0xa0] sm:$0xff]   ;;  %v1004_v56 = vld [vmem:[#allocation7 + $0x28] sm:$0xff]  }
  0x4a   :  { %294 = vmatpush1.bf16.msra.mxu0 %v961_v19  ;;  %337 = vmatpush1.bf16.msra.mxu1 %v962_v20  ;;  %v1005_v57 = vld [vmem:[#allocation7 + $0xa8] sm:$0xff]   ;;  %v1006_v58 = vld [vmem:[#allocation7 + $0x70] sm:$0xff]   ;;  %v1010_v62 = vld [vmem:[#allocation7 + $0x78] sm:$0xff]  }
  0x4b   :  { %295 = vmatprep.subr.bf16.mxu0 %v963_v21  ;;  %338 = vmatprep.subr.bf16.mxu1 %v965_v22  ;;  %v1007_v59 = vld [vmem:[#allocation7 + $0xf0] sm:$0xff]   ;;  %v1011_v63 = vld [vmem:[#allocation7 + $0xf8] sm:$0xff]  }
  0x4c   :  { %v1008_v60 = vld [vmem:[#allocation7 + $0x30] sm:$0xff]   ;;  %v1012_v0 = vld [vmem:[#allocation7 + $0x38] sm:$0xff]  }
  0x4d   :  { %v1009_v61 = vld [vmem:[#allocation7 + $0xb0] sm:$0xff]   ;;  %v1013_v1 = vld [vmem:[#allocation7 + $0xb8] sm:$0xff]  }
  0x4e   :  { %296 = vmatpush1.bf16.msra.mxu0 %v967_v23  ;;  %339 = vmatpush1.bf16.msra.mxu1 %v968_v24  ;;  %v97_v6 = vld [vmem:[%s1263_s2] sm:$0xf] }
  0x4f   :  { %297 = vmatprep.subr.bf16.mxu0 %v969_v25  ;;  %340 = vmatprep.subr.bf16.mxu1 %v971_v26  ;;  %v102_v9 = vrot.slane %v97_v6, %v101_v4  ;;  %v110_v10 = vrot.slane %v97_v6, %v109_v5  ;;  %v106_v11 = vrot.slane %v97_v6, %v105_v7 }
  0x50   :  { %v114_v12 = vrot.slane %v97_v6, %v113_v8 }
  0x52   :  { %298 = vmatpush1.bf16.msra.mxu0 %v973_v27  ;;  %341 = vmatpush1.bf16.msra.mxu1 %v974_v28 }
  0x53   :  { %299 = vmatprep.subr.bf16.mxu0 %v975_v29  ;;  %342 = vmatprep.subr.bf16.mxu1 %v977_v30 }
  0x56   :  { %300 = vmatpush1.bf16.msra.mxu0 %v979_v31  ;;  %343 = vmatpush1.bf16.msra.mxu1 %v980_v32 }
  0x57   :  { %878 = vmatprep.subr.bf16.mxu0 %v982_v34  ;;  %900 = vmatprep.subr.bf16.mxu1 %v983_v35 }
  0x59   :  { %318 = vmatmul.mubr.bf16.vlgmr.msra.gmra.mrb[0].mxu0 %v981_v33  ;;  %361 = vmatmul.mubr.bf16.vlgmr.msra.gmra.mrb[0].mxu1 %v981_v33 }
  0x5a   :  { %879 = vmatpush3.bf16.msra.mxu0 %v984_v36  ;;  %901 = vmatpush3.bf16.msra.mxu1 %v985_v37 }
  0x5b   :  { %880 = vmatprep.subr.bf16.mxu0 %v986_v38  ;;  %902 = vmatprep.subr.bf16.mxu1 %v987_v39 }
  0x5e   :  { %881 = vmatpush3.bf16.msra.mxu0 %v988_v40  ;;  %903 = vmatpush3.bf16.msra.mxu1 %v989_v41 }
  0x5f   :  { %882 = vmatprep.subr.bf16.mxu0 %v990_v42  ;;  %904 = vmatprep.subr.bf16.mxu1 %v991_v43 }
  0x62   :  { %883 = vmatpush3.bf16.msra.mxu0 %v992_v44  ;;  %905 = vmatpush3.bf16.msra.mxu1 %v993_v45 }
  0x63   :  { %884 = vmatprep.subr.bf16.mxu0 %v994_v46  ;;  %906 = vmatprep.subr.bf16.mxu1 %v995_v47 }
  0x66   :  { %885 = vmatpush3.bf16.msra.mxu0 %v996_v48  ;;  %907 = vmatpush3.bf16.msra.mxu1 %v997_v49 }
  0x67   :  { %886 = vmatprep.subr.bf16.mxu0 %v998_v50  ;;  %908 = vmatprep.subr.bf16.mxu1 %v999_v51 }
  0x6a   :  { %887 = vmatpush3.bf16.msra.mxu0 %v1000_v52  ;;  %909 = vmatpush3.bf16.msra.mxu1 %v1001_v53 }
  0x6b   :  { %888 = vmatprep.subr.bf16.mxu0 %v1002_v54  ;;  %910 = vmatprep.subr.bf16.mxu1 %v1003_v55 }
  0x6e   :  { %889 = vmatpush3.bf16.msra.mxu0 %v1004_v56  ;;  %911 = vmatpush3.bf16.msra.mxu1 %v1005_v57 }
  0x6f   :  { %890 = vmatprep.subr.bf16.mxu0 %v1006_v58  ;;  %912 = vmatprep.subr.bf16.mxu1 %v1007_v59 }
  0x72   :  { %891 = vmatpush3.bf16.msra.mxu0 %v1008_v60  ;;  %913 = vmatpush3.bf16.msra.mxu1 %v1009_v61 }
  0x73   :  { %892 = vmatprep.subr.bf16.mxu0 %v1010_v62  ;;  %914 = vmatprep.subr.bf16.mxu1 %v1011_v63 }
  0x76   :  { %893 = vmatpush3.bf16.msra.mxu0 %v1012_v0  ;;  %915 = vmatpush3.bf16.msra.mxu1 %v1013_v1 }
 0x12c   :  { %v319_v13 = vpop.f32.mrb[0].mxu0  ;;  %v362_v14 = vpop.f32.mrb[0].mxu1 }
 0x12d   :  { %v1204_v15 = vadd.f32 %v319_v13, %v102_v9  ;;  %v1206_v16 = vadd.f32 %v362_v14, %v110_v10  ;;  %v321_v17 = vpop.f32.mrb[1].mxu0  ;;  %v364_v18 = vpop.f32.mrb[1].mxu1 }
 0x12e   :  { %v1208_v19 = vadd.f32 %v321_v17, %v106_v11  ;;  %v1210_v20 = vadd.f32 %v364_v18, %v114_v12  ;;  %v323_v21 = vpop.f32.mrb[2].mxu0  ;;  %v366_v22 = vpop.f32.mrb[2].mxu1 }
 0x12f   :  { %v379_v23 = vmul.f32 0.044715, %v1204_v15  ;;  %v381_v24 = vmul.f32 0.044715, %v1206_v16  ;;  %v324_v25 = vadd.f32 %v323_v21, %v102_v9  ;;  %v367_v26 = vadd.f32 %v366_v22, %v110_v10  ;;  %v325_v27 = vpop.f32.mrb[3].mxu0  ;;  %v368_v28 = vpop.f32.mrb[3].mxu1 }
 0x130   :  { %v380_v29 = vmul.f32 0.044715, %v1208_v19  ;;  %v382_v30 = vmul.f32 0.044715, %v1210_v20  ;;  %v1216_v31 = vadd.f32 %v325_v27, %v106_v11  ;;  %v1218_v32 = vadd.f32 %v368_v28, %v114_v12 }
 0x131   :  { %v387_v33 = vmul.f32 %v379_v23, %v1204_v15  ;;  %v389_v34 = vmul.f32 %v381_v24, %v1206_v16  ;;  %v383_v35 = vmul.f32 0.044715, %v324_v25  ;;  %v385_v36 = vmul.f32 0.044715, %v367_v26 }
 0x132   :  { %v388_v37 = vmul.f32 %v380_v29, %v1208_v19  ;;  %v390_v38 = vmul.f32 %v382_v30, %v1210_v20  ;;  %v384_v39 = vmul.f32 0.044715, %v1216_v31  ;;  %v386_v40 = vmul.f32 0.044715, %v1218_v32 }
 0x133   :  { %v395_v41 = vmul.f32 %v387_v33, %v1204_v15  ;;  %v397_v42 = vmul.f32 %v389_v34, %v1206_v16  ;;  %v391_v43 = vmul.f32 %v383_v35, %v324_v25  ;;  %v393_v44 = vmul.f32 %v385_v36, %v367_v26 }
 0x134   :  { %v396_v45 = vmul.f32 %v388_v37, %v1208_v19  ;;  %v398_v46 = vmul.f32 %v390_v38, %v1210_v20  ;;  %v392_v47 = vmul.f32 %v384_v39, %v1216_v31  ;;  %v394_v48 = vmul.f32 %v386_v40, %v1218_v32 }
 0x135   :  { %v403_v49 = vadd.f32 %v395_v41, %v1204_v15  ;;  %v405_v50 = vadd.f32 %v397_v42, %v1206_v16  ;;  %v399_v51 = vmul.f32 %v391_v43, %v324_v25  ;;  %v401_v52 = vmul.f32 %v393_v44, %v367_v26 }
 0x136   :  { %v400_v53 = vmul.f32 %v392_v47, %v1216_v31  ;;  %v402_v54 = vmul.f32 %v394_v48, %v1218_v32  ;;  %v404_v59 = vadd.f32 %v396_v45, %v1208_v19  ;;  %v406_v63 = vadd.f32 %v398_v46, %v1210_v20 }
 0x137   :  { %v411_v55 = vmul.f32 0.7978846, %v403_v49  ;;  %v413_v56 = vmul.f32 0.7978846, %v405_v50  ;;  %v407_v57 = vadd.f32 %v399_v51, %v324_v25  ;;  %v409_v58 = vadd.f32 %v401_v52, %v367_v26 }
 0x138   :  { %v408_v60 = vadd.f32 %v400_v53, %v1216_v31  ;;  %v412_v0 = vmul.f32 0.7978846, %v404_v59  ;;  %v410_v2 = vadd.f32 %v402_v54, %v1218_v32  ;;  %v414_v3 = vmul.f32 0.7978846, %v406_v63 }
 0x139   :  { %1014 = vtanh.f32 %v411_v55  ;;  %v415_v61 = vmul.f32 0.7978846, %v407_v57  ;;  %v417_v62 = vmul.f32 0.7978846, %v409_v58  ;;  %v371_v11 = vmul.f32 0.5, %v1204_v15 }
 0x13a   :  { %1016 = vtanh.f32 %v413_v56  ;;  %v416_v1 = vmul.f32 0.7978846, %v408_v60  ;;  %v418_v4 = vmul.f32 0.7978846, %v410_v2  ;;  %v375_v12 = vmul.f32 0.5, %v324_v25 }
 0x13b   :  { %1018 = vtanh.f32 %v415_v61  ;;  %v373_v17 = vmul.f32 0.5, %v1206_v16  ;;  %v377_v18 = vmul.f32 0.5, %v367_v26  ;;  %v372_v23 = vmul.f32 0.5, %v1208_v19 }
 0x13c   :  { %1020 = vtanh.f32 %v417_v62  ;;  %v376_v30 = vmul.f32 0.5, %v1216_v31  ;;  %v374_v25 = vmul.f32 0.5, %v1210_v20  ;;  %v378_v36 = vmul.f32 0.5, %v1218_v32  ;;  %v845_v20 = vld [vmem:[%s1265_s4] ss:$0 sm:$0xff]  ;;  %s1096_s4 = scalar_lea.vmem %s800_s9, 256 }
 0x13d   :  { %1022 = vtanh.f32 %v412_v0  ;;  %p1097_p10 = scmp.ne.s32.totalorder %s800_s9, %s1096_s4  ;;  %p1102_p12 = scmp.lt.s32.totalorder %s1096_s4, %s1096_s4 }
 0x13e   :  { %1024 = vtanh.f32 %v416_v1 }
 0x13f   :  { %1026 = vtanh.f32 %v414_v3  ;;  %p1103_p13 = por %p1102_p12, %p1101_p11 }
 0x140   :  { %1028 = vtanh.f32 %v418_v4 }
 0x141   :  { %p1104_p0 = pnand %p1103_p13, %p1097_p10 }
 0x143   :  { %v1015_v5 = vpop.eup %1014 }
 0x144   :  { %v1017_v6 = vpop.eup %1016  ;;  %v427_v7 = vadd.f32 1.0, %v1015_v5 }
 0x145   :  { %v1019_v8 = vpop.eup %1018  ;;  %v429_v9 = vadd.f32 1.0, %v1017_v6 }
 0x146   :  { %v1021_v10 = vpop.eup %1020  ;;  %v431_v13 = vadd.f32 1.0, %v1019_v8  ;;  %v435_v27 = vmul.f32 %v427_v7, %v371_v11 }
 0x147   :  { %v1023_v14 = vpop.eup %1022  ;;  %v433_v21 = vadd.f32 1.0, %v1021_v10  ;;  %v437_v34 = vmul.f32 %v429_v9, %v373_v17 }
 0x148   :  { %v1025_v22 = vpop.eup %1024  ;;  %v428_v24 = vadd.f32 1.0, %v1023_v14  ;;  %v439_v28 = vmul.f32 %v431_v13, %v375_v12 }
 0x149   :  { %v1027_v29 = vpop.eup %1026  ;;  %v432_v33 = vadd.f32 1.0, %v1025_v22  ;;  %v441_v35 = vmul.f32 %v433_v21, %v377_v18 }
 0x14a   :  { %v1029_v15 = vpop.eup %1028  ;;  %v430_v16 = vadd.f32 1.0, %v1027_v29  ;;  %v443_v26 = vpack.c.bf16 %v439_v28, %v435_v27  ;;  %v436_v37 = vmul.f32 %v428_v24, %v372_v23 }
 0x14b   :  { %v440_v38 = vmul.f32 %v432_v33, %v376_v30  ;;  %v434_v39 = vadd.f32 1.0, %v1029_v15  ;;  %v445_v19 = vpack.c.bf16 %v441_v35, %v437_v34 }
 0x14c   :  { %v438_v41 = vmul.f32 %v430_v16, %v374_v25 }
 0x14d   :  { %v444_v40 = vpack.c.bf16 %v440_v38, %v436_v37  ;;  %v442_v42 = vmul.f32 %v434_v39, %v378_v36 }
 0x14f   :  { %742 = vmatprep.mubr.bf16.mxu0 %v444_v40  ;;  %v446_v43 = vpack.c.bf16 %v442_v42, %v438_v41 }
 0x150   :  { %743 = vmatmul.mubr.bf16.vlgmr.msra.gmra.mrb[4].mxu0 %v443_v26 }
 0x151   :  { %783 = vmatprep.mubr.bf16.mxu1 %v446_v43 }
 0x152   :  { %784 = vmatmul.mubr.bf16.vlgmr.msra.gmra.mrb[4].mxu1 %v445_v19 }
 0x223   :  { %v894_v31 = vpop.f32.mrb[4].mxu0 }
 0x224   :  { %v895_v32 = vpop.f32.mrb[5].mxu0 }
 0x225   :  { %v916_v44 = vpop.f32.mrb[4].mxu1  ;;  %v896_v45 = vadd.f32 %v895_v32, %v894_v31  ;;  %v897_v46 = vpop.f32.mrb[6].mxu0 }
 0x226   :  { %v917_v47 = vpop.f32.mrb[5].mxu1  ;;  %v898_v48 = vpop.f32.mrb[7].mxu0 }
 0x227   :  { %v745_v49 = vadd.f32 %v896_v45, %v845_v20  ;;  %v918_v50 = vadd.f32 %v917_v47, %v916_v44  ;;  %v919_v51 = vpop.f32.mrb[6].mxu1  ;;  %v899_v52 = vadd.f32 %v898_v48, %v897_v46 }
 0x228   :  { %v920_v53 = vpop.f32.mrb[7].mxu1 }
 0x229   :  { %v786_v54 = vadd.f32 %v918_v50, %v745_v49  ;;  %v748_v55 = vadd.f32 %v899_v52, %v845_v20  ;;  %v921_v56 = vadd.f32 %v920_v53, %v919_v51 }
 0x22b   :  { %792 = vst [vmem:[#allocation8] sm:$0xff] %v786_v54  ;;  %v789_v57 = vadd.f32 %v921_v56, %v748_v55 }
 0x22d   :  { %793 = vst [vmem:[#allocation8 + $0x8] sm:$0xff] %v789_v57 }
 0x22e   :  { %1107 = shalt.err (!%p1104_p0)
}
 0x22f   :  { %s1108_s12 = scalar_lea.hbm %s1266_s5, 256 }
 0x230   :  { %p1109_p1 = scmp.ne.s32.totalorder %s1266_s5, %s1108_s12  ;;  %p1112_p2 = scmp.lt.u32.totalorder %s1108_s12, %s1266_s5 }
 0x232   :  { %p1114_p3 = pnand %p1112_p2, %p1109_p1 }
 0x234   :  { %1117 = shalt.err (!%p1114_p3)
}
 0x235   :  { %s1133_s1 = smov 128   ;;  %s1134_s17 = smov 8  }
 0x236   :  { %805 = dma.vmem_to_hbm [thread:$0]  %s800_s9, 256, %s1266_s5, [#allocation4], %s1133_s1, %s1133_s1, %s1134_s17  }
 0x237   :  { %1122 = dma.done.wait [#allocation4], 256  }
 0x238   :  { %1123 = vsyncadd [#allocation4], 4294967040 }
 0x239   :  { %809 = vsyncpa [#allocation3], 1 }
 0x23a   :  { %810 = vsyncpa [#allocation6], 1 }
 0x23b   :  { %811 = vsyncpa [#allocation4], 1 }

</bundles_post_ra>
